<compile_context>
chip_gen: v6e
topology: v6e:2x2x1
jax: 0.10.0
libtpu: 0.0.40
codegen_flags: <defaults>
</compile_context>

<pallas_src>
import functools

import jax
import jax.numpy as jnp
import numpy as np
from jax.experimental import pallas as pl
from jax.experimental.pallas import tpu as pltpu

_LANE = 128                       # TPU vreg lane width
_ROW_CAP = 512                    # batch-tile sweet spot (~85%+ of HBM roofline)
_VMEM_BUDGET = 16 * 1024 * 1024   # per-step VMEM incl. double-buffering (v7x-safe)
_FAST_PATH_BYTES = 256 * 1024     # below this, launch/DMA-setup overhead dominates


def _group_segments(arrays_lengths, lane=_LANE):
    """Greedily merge consecutive segments into lane-aligned column groups.

    Every group start is a multiple of `lane`, and every group width (except
    possibly the last, ragged one) is a multiple of `lane`, so the kernel's
    feature-axis slices are lane-aligned and its output stores are unmasked.

    Returns: list of (start, width, [(seg_idx, seg_len), ...]).
    """
    groups, cur_segs = [], []
    cur_start, offset = 0, 0
    for idx, l in enumerate(arrays_lengths):
        cur_segs.append((idx, l))
        offset += l
        if offset % lane == 0:            # aligned boundary -> close the group
            groups.append((cur_start, offset - cur_start, cur_segs))
            cur_segs, cur_start = [], offset
    if cur_segs:                          # ragged tail (its start is still aligned)
        groups.append((cur_start, offset - cur_start, cur_segs))
    return groups


def _splitter_kernel(group_slices, x_ref, *out_refs):
    """Copy each lane-aligned column group of the current batch tile."""
    for (start, width), o_ref in zip(group_slices, out_refs):
        # Static, lane-aligned slice along the feature (lane) axis -> plain
        # vreg moves; full-tile store to a lane-dense output block.
        o_ref[...] = x_ref[:, start:start + width]


def _pick_batch_tile(batch, features, itemsize):
    """Largest batch tile that (a) is a sublane multiple and (b) fits VMEM."""
    sub = max(8, 32 // max(itemsize, 1))  # sublane multiple: f32->8, bf16->16, i8->32
    # Per grid step: input tile + output tiles ~= 2x tile bytes; BlockSpec
    # double-buffering doubles that again -> 4 * tile_b * features * itemsize.
    by_budget = _VMEM_BUDGET // max(1, 4 * features * itemsize)
    tile_b = max(sub, min(_ROW_CAP, by_budget))
    tile_b = max(sub, (tile_b // sub) * sub)
    if tile_b >= batch:
        return batch                      # single block == full array dim (always legal)
    return tile_b                         # sublane multiple; ragged tail handled by Pallas


def splitter_layer(x, arrays_lengths, *, force_pallas=False):
    """Pallas implementation of SplitterLayer.forward.

    Args:
      x: (batch, features) array with features == sum(arrays_lengths).
      arrays_lengths: python list/tuple of ints.
      force_pallas: skip the small-shape fast path (for testing the kernel).

    Returns:
      List of arrays, the i-th of shape (batch, arrays_lengths[i]).
    """
    arrays_lengths = [int(l) for l in arrays_lengths]
    batch, features = x.shape
    assert features == sum(arrays_lengths), (
        f"sum(arrays_lengths)={sum(arrays_lengths)} != features={features}")

    cum = [0] + np.cumsum(arrays_lengths).tolist()

    # Fast path: pure data movement — for tiny tensors or degenerate
    # (zero-length) splits, plain XLA slices beat a kernel dispatch outright.
    tiny = x.size * x.dtype.itemsize < _FAST_PATH_BYTES
    degenerate = features == 0 or any(l == 0 for l in arrays_lengths)
    if (tiny and not force_pallas) or degenerate:
        return [x[:, cum[i]:cum[i + 1]] for i in range(len(arrays_lengths))]

    groups = _group_segments(arrays_lengths)
    group_slices = tuple((start, width) for start, width, _ in groups)

    tile_b = _pick_batch_tile(batch, features, x.dtype.itemsize)
    grid = (pl.cdiv(batch, tile_b),)

    out_shapes = tuple(
        jax.ShapeDtypeStruct((batch, width), x.dtype) for _, width, _ in groups)

    group_outs = pl.pallas_call(
        functools.partial(_splitter_kernel, group_slices),
        out_shape=out_shapes,
        grid=grid,
        in_specs=[pl.BlockSpec((tile_b, features), lambda i: (i, 0))],
        out_specs=tuple(
            pl.BlockSpec((tile_b, width), lambda i: (i, 0))
            for _, width, _ in groups),
        compiler_params=pltpu.CompilerParams(
            dimension_semantics=("parallel",),      # shard batch tiles across TCs
            vmem_limit_bytes=48 * 1024 * 1024),
    )(x)

    # Un-group: cheap XLA sub-slices of the lane-dense group outputs.
    outs = [None] * len(arrays_lengths)
    for (_, _, segs), g_out in zip(groups, group_outs):
        if len(segs) == 1:                # already lane-aligned split: direct output
            outs[segs[0][0]] = g_out
            continue
        local = 0
        for seg_idx, seg_len in segs:
            outs[seg_idx] = jax.lax.slice_in_dim(g_out, local, local + seg_len, axis=1)
            local += seg_len
    return outs


if __name__ == "__main__":
    root = jax.random.PRNGKey(0)
    k1, k2 = jax.random.split(root)

    # --- Case 1: exercise the Pallas kernel (small but lane-rich shape). ---
    batch = 16
    arrays_lengths = [8, 24, 96, 128, 64, 192]        # sum = 512 features
    features = sum(arrays_lengths)
    x = jax.random.normal(k1, (batch, features), dtype=jnp.float32)

    outs = splitter_layer(x, arrays_lengths, force_pallas=True)
    outs = jax.block_until_ready(outs)

    cum = [0] + np.cumsum(arrays_lengths).tolist()
    x_np = np.asarray(x)
    refs = [x_np[:, cum[i]:cum[i + 1]] for i in range(len(arrays_lengths))]
    for o, r in zip(outs, refs):
        assert o.shape == r.shape, (o.shape, r.shape)
        np.testing.assert_array_equal(np.asarray(o), r)

    # --- Case 2: tiny shape takes the slice-only fast path (no kernel). ---
    batch2, lens2 = 2, [8, 16, 8]
    x2 = jax.random.normal(k2, (batch2, sum(lens2)), dtype=jnp.float32)
    outs2 = jax.block_until_ready(splitter_layer(x2, lens2))
    cum2 = [0] + np.cumsum(lens2).tolist()
    x2_np = np.asarray(x2)
    for i, o in enumerate(outs2):
        np.testing.assert_array_equal(np.asarray(o), x2_np[:, cum2[i]:cum2[i + 1]])

    print("KERNEL_OK")
</pallas_src>

<mosaic_0001>
module attributes {stable_mosaic.version = 11 : i64} {
  func.func @_splitter_kernel(%arg0: i32, %arg1: memref<16x512xf32, #tpu.memory_space<vmem>>, %arg2: memref<16x128xf32, #tpu.memory_space<vmem>>, %arg3: memref<16x128xf32, #tpu.memory_space<vmem>>, %arg4: memref<16x256xf32, #tpu.memory_space<vmem>>) attributes {dimension_semantics = [#tpu.dimension_semantics<parallel>], iteration_bounds = array<i64: 1>, scalar_prefetch = 0 : i64, scratch_operands = 0 : i64, tpu.core_type = #tpu.core_type<tc>, window_params = [{transform_indices = @transform_0, window_bounds = array<i64: 16, 512>}, {transform_indices = @transform_1, window_bounds = array<i64: 16, 128>}, {transform_indices = @transform_2, window_bounds = array<i64: 16, 128>}, {transform_indices = @transform_3, window_bounds = array<i64: 16, 256>}]} {
    %c0 = arith.constant 0 : index
    %c0_0 = arith.constant 0 : index
    %0 = vector.load %arg1[%c0, %c0_0] : memref<16x512xf32, #tpu.memory_space<vmem>>, vector<16x128xf32>
    %c0_1 = arith.constant 0 : index
    %c0_2 = arith.constant 0 : index
    %1 = vector.load %arg2[%c0_1, %c0_2] : memref<16x128xf32, #tpu.memory_space<vmem>>, vector<16x128xf32>
    tpu.vector_store %arg2[%c0_1, %c0_2], %0 {strides = array<i32>} : memref<16x128xf32, #tpu.memory_space<vmem>>, vector<16x128xf32>,
    %c0_3 = arith.constant 0 : index
    %c128 = arith.constant 128 : index
    %2 = vector.load %arg1[%c0_3, %c128] : memref<16x512xf32, #tpu.memory_space<vmem>>, vector<16x128xf32>
    %c0_4 = arith.constant 0 : index
    %c0_5 = arith.constant 0 : index
    %3 = vector.load %arg3[%c0_4, %c0_5] : memref<16x128xf32, #tpu.memory_space<vmem>>, vector<16x128xf32>
    tpu.vector_store %arg3[%c0_4, %c0_5], %2 {strides = array<i32>} : memref<16x128xf32, #tpu.memory_space<vmem>>, vector<16x128xf32>,
    %c0_6 = arith.constant 0 : index
    %c256 = arith.constant 256 : index
    %4 = vector.load %arg1[%c0_6, %c256] : memref<16x512xf32, #tpu.memory_space<vmem>>, vector<16x256xf32>
    %c0_7 = arith.constant 0 : index
    %c0_8 = arith.constant 0 : index
    %5 = vector.load %arg4[%c0_7, %c0_8] : memref<16x256xf32, #tpu.memory_space<vmem>>, vector<16x256xf32>
    tpu.vector_store %arg4[%c0_7, %c0_8], %4 {strides = array<i32>} : memref<16x256xf32, #tpu.memory_space<vmem>>, vector<16x256xf32>,
    return
  }
  func.func @transform_0(%arg0: i32) -> (i32, i32) {
    %c0_i32 = arith.constant 0 : i32
    %c0_i32_0 = arith.constant 0 : i32
    return %arg0, %c0_i32 : i32, i32
  }
  func.func @transform_1(%arg0: i32) -> (i32, i32) {
    %c0_i32 = arith.constant 0 : i32
    %c0_i32_0 = arith.constant 0 : i32
    return %arg0, %c0_i32 : i32, i32
  }
  func.func @transform_2(%arg0: i32) -> (i32, i32) {
    %c0_i32 = arith.constant 0 : i32
    %c0_i32_0 = arith.constant 0 : i32
    return %arg0, %c0_i32 : i32, i32
  }
  func.func @transform_3(%arg0: i32) -> (i32, i32) {
    %c0_i32 = arith.constant 0 : i32
    %c0_i32_0 = arith.constant 0 : i32
    return %arg0, %c0_i32 : i32, i32
  }
}

</mosaic_0001>

<bundles_post_ra>
// kernel: tpu_custom_call.1
= control target key start
LH: loop header
LB: loop body
LE: loop exit
PB: predicated region body
PF: predicated region fallthrough
CT: control target
= control target key end

     0   :  { %9 = vsyncpa [#allocation3], 0  ;;  %s250_s0 = inlined_call_operand.hbm [shape: f32[16,512], index: 0, kind: input, shape index: {}]   ;;  %s251_s1 = inlined_call_operand.hbm [shape: f32[16,128], index: 1, kind: output, shape index: {0}]   ;;  %s252_s2 = inlined_call_operand.hbm [shape: f32[16,128], index: 2, kind: output, shape index: {1}]   ;;  %s253_s3 = inlined_call_operand.hbm [shape: f32[16,256], index: 3, kind: output, shape index: {2}]  }
   0x1   :  { %10 = vsyncpa [#allocation4], 0 }
   0x2   :  { %11 = vsyncpa [#allocation7], 0  ;;  %s187_s12 = smov [#allocation2]  }
   0x3   :  { %s17_s13 = sshll.u32 %s187_s12, 4  ;;  %s18_s13 = int_to_ptr.vmem [resolvable:$true] %s17_s13 }
   0x4   :  { %s109_s14 = scalar_lea.vmem %s18_s13, 1024  ;;  %p114_p1 = scmp.lt.s32.totalorder %s18_s13, %s18_s13 }
   0x5   :  { %p110_p0 = scmp.ne.s32.totalorder %s18_s13, %s109_s14  ;;  %p115_p2 = scmp.lt.s32.totalorder %s109_s14, %s109_s14 }
   0x7   :  { %p116_p3 = por %p115_p2, %p114_p1 }
   0x9   :  { %p117_p4 = pnand %p116_p3, %p110_p0 }
   0xb   :  { %120 = shalt.err (!%p117_p4)
}
   0xc   :  { %s188_s15 = smov 512   ;;  %s189_s16 = smov 32  }
   0xd   :  { %23 = dma.hbm_to_vmem [thread:$0]  %s250_s0, 1024, %s18_s13, [#allocation3], %s188_s15, %s188_s15, %s189_s16  }
   0xe   :  { %181 = dma.done.wait [#allocation3], 1024  }
   0xf   :  { %182 = vsyncadd [#allocation3], 4294966272  ;;  %s190_s19 = smov [#allocation6]   ;;  %s191_s21 = smov [#allocation5]   ;;  %v31_v0 = vld [vmem:[#allocation2 + $0x8] sm:$0xff]  ;;  %v27_v2 = vld [vmem:[#allocation2] sm:$0xff] }
  0x10   :  { %s60_s20 = sshll.u32 %s190_s19, 4  ;;  %s48_s22 = sshll.u32 %s191_s21, 4  ;;  %v32_v1 = vld [vmem:[#allocation2 + $0x28] sm:$0xff]  ;;  %33 = vst [vmem:[#allocation6] sm:$0xff] %v31_v0  ;;  %29 = vst [vmem:[#allocation5] sm:$0xff] %v27_v2  ;;  %v28_v3 = vld [vmem:[#allocation2 + $0x20] sm:$0xff]  ;;  %s220_s20 = int_to_ptr.vmem [resolvable:$true] %s60_s20  ;;  %s222_s22 = int_to_ptr.vmem [resolvable:$true] %s48_s22 }
  0x11   :  { %s192_s23 = smov [#allocation8]   ;;  %34 = vst [vmem:[#allocation6 + $0x8] sm:$0xff] %v32_v1  ;;  %v35_v4 = vld [vmem:[#allocation2 + $0x10] sm:$0xff]  ;;  %v36_v5 = vld [vmem:[#allocation2 + $0x18] sm:$0xff]  ;;  %30 = vst [vmem:[#allocation5 + $0x8] sm:$0xff] %v28_v3  ;;  %s121_s0 = scalar_lea.vmem %s220_s20, 256 }
  0x12   :  { %s72_s24 = sshll.u32 %s192_s23, 4  ;;  %39 = vst [vmem:[#allocation8] sm:$0xff] %v35_v4  ;;  %40 = vst [vmem:[#allocation8 + $0x8] sm:$0xff] %v36_v5  ;;  %v37_v6 = vld [vmem:[#allocation2 + $0x30] sm:$0xff]  ;;  %v38_v7 = vld [vmem:[#allocation2 + $0x38] sm:$0xff]  ;;  %p122_p5 = scmp.ne.s32.totalorder %s220_s20, %s121_s0  ;;  %s224_s24 = int_to_ptr.vmem [resolvable:$true] %s72_s24 }
  0x13   :  { %p126_p6 = scmp.lt.s32.totalorder %s220_s20, %s220_s20  ;;  %p127_p7 = scmp.lt.s32.totalorder %s121_s0, %s121_s0 }
  0x15   :  { %p128_p8 = por %p127_p7, %p126_p6 }
  0x17   :  { %p129_p9 = pnand %p128_p8, %p122_p5 }
  0x19   :  { %132 = shalt.err (!%p129_p9)
}
  0x1a   :  { %s193_s25 = smov 128   ;;  %s194_s26 = smov 8   ;;  %41 = vst [vmem:[#allocation8 + $0x10] sm:$0xff] %v37_v6  ;;  %42 = vst [vmem:[#allocation8 + $0x18] sm:$0xff] %v38_v7 }
  0x1b   :  { %66 = dma.vmem_to_hbm [thread:$0]  %s220_s20, 256, %s252_s2, [#allocation7], %s193_s25, %s193_s25, %s194_s26  }
  0x1c   :  { %s141_s29 = scalar_lea.vmem %s222_s22, 256  ;;  %p146_p11 = scmp.lt.s32.totalorder %s222_s22, %s222_s22 }
  0x1d   :  { %p142_p10 = scmp.ne.s32.totalorder %s222_s22, %s141_s29  ;;  %p147_p12 = scmp.lt.s32.totalorder %s141_s29, %s141_s29 }
  0x1f   :  { %p148_p13 = por %p147_p12, %p146_p11 }
  0x21   :  { %p149_p0 = pnand %p148_p13, %p142_p10 }
  0x23   :  { %152 = shalt.err (!%p149_p0)
}
  0x24   :  { %54 = dma.vmem_to_hbm [thread:$0]  %s222_s22, 256, %s251_s1, [#allocation4], %s193_s25, %s193_s25, %s194_s26  }
  0x25   :  { %s161_s5 = scalar_lea.vmem %s224_s24, 512  ;;  %p166_p2 = scmp.lt.s32.totalorder %s224_s24, %s224_s24 }
  0x26   :  { %p162_p1 = scmp.ne.s32.totalorder %s224_s24, %s161_s5  ;;  %p167_p3 = scmp.lt.s32.totalorder %s161_s5, %s161_s5 }
  0x28   :  { %p168_p4 = por %p167_p3, %p166_p2 }
  0x2a   :  { %p169_p5 = pnand %p168_p4, %p162_p1 }
  0x2c   :  { %172 = shalt.err (!%p169_p5)
}
  0x2d   :  { %s195_s2 = smov 256   ;;  %s196_s6 = smov 16  }
  0x2e   :  { %78 = dma.vmem_to_hbm [thread:$0]  %s224_s24, 512, %s253_s3, [#allocation7], %s195_s2, %s195_s2, %s196_s6  }
  0x2f   :  { %183 = dma.done.wait [#allocation4], 256  }
  0x30   :  { %184 = vsyncadd [#allocation4], 4294967040 }
  0x31   :  { %185 = dma.done.wait [#allocation7], 768  }
  0x32   :  { %186 = vsyncadd [#allocation7], 4294966528 }
  0x33   :  { %88 = vsyncpa [#allocation3], 1 }
  0x34   :  { %89 = vsyncpa [#allocation4], 1 }
  0x35   :  { %90 = vsyncpa [#allocation7], 1 }

</bundles_post_ra>
